<compile_context>
chip_gen: v7x
topology: tpu7x:2x2x1
jax: 0.10.0
libtpu: 0.0.40
codegen_flags: <defaults>
</compile_context>

<pallas_src>
import functools

import jax
import jax.numpy as jnp
from jax.experimental import pallas as pl
from jax.experimental.pallas import tpu as pltpu


_LANE = 128
_WIDTHS = (2048, 1024, 512, 256, 128)   # candidate lane-dense slab widths
_FAST_PATH_F32_BYTES = 8 * 1024 * 1024  # fused-kernel threshold (f32 footprint)


# ----------------------------------------------------------------- sizing ---
def _vmem_limit_bytes():
    """Generation-aware scoped-VMEM limit (leaves headroom under physical)."""
    cap = 64 * 1024 * 1024  # conservative default (v7x per-TC physical VMEM)
    try:
        info = pltpu.get_tpu_info()
        cap = int(getattr(info, "vmem_capacity_bytes", cap) or cap)
    except Exception:
        pass
    # v5e/v6e (128 MiB physical) -> 96 MiB limit; v7x (64 MiB) -> 48 MiB limit.
    return int(min(96 * 1024 * 1024, (3 * cap) // 4))


def _block_bytes(vmem_limit):
    # pass 1: only the input is double-buffered (output + scratch are tiny).
    p1 = min(16 * 1024 * 1024, vmem_limit // 3)
    # pass 2: input and output both double-buffered (~4x block live).
    p2 = min(8 * 1024 * 1024, vmem_limit // 5)
    return p1, p2


def _pick_width(n):
    for w in _WIDTHS:
        if n % w == 0:
            return w
    return None


# ---------------------------------------------------------------- kernels ---
def _fused_kernel(om_ref, x_ref, o_ref, *, inv_n):
    """Small-input fast path: sum -> scale -> write, whole array in VMEM."""
    x = x_ref[...].astype(jnp.float32)
    mean = jnp.sum(x) * inv_n
    scale = om_ref[0, 0] / (mean + jnp.float32(1e-6))
    o_ref[...] = (x * scale).astype(o_ref.dtype)


def _sum_kernel(x_ref, out_ref, acc_ref, *, valid_rows, block_rows, inner,
                may_mask):
    c = pl.program_id(0)          # shard axis ("parallel", 2 TCs on v7x)
    i = pl.program_id(1)          # reduction axis ("arbitrary")

    @pl.when(i == 0)
    def _():
        acc_ref[...] = jnp.zeros_like(acc_ref)

    x = x_ref[...].astype(jnp.float32)
    br, w = x.shape               # br is a multiple of 8 (wrapper guarantees)

    def _acc(v):
        # VPU-only vreg adds into an (8, W) accumulator (no XLU per step).
        acc_ref[...] += v.reshape(br // 8, 8, w).sum(axis=0)

    if may_mask:
        row0 = (c * inner + i) * block_rows
        need_mask = (row0 + block_rows) > valid_rows

        @pl.when(jnp.logical_not(need_mask))
        def _():
            _acc(x)

        @pl.when(need_mask)     # only trailing / out-of-range shard blocks
        def _():
            rid = row0 + jax.lax.broadcasted_iota(jnp.int32, x.shape, 0)
            _acc(jnp.where(rid < valid_rows, x, 0.0))
    else:
        _acc(x)

    @pl.when(i == pl.num_programs(1) - 1)
    def _():
        # Fold lanes down to 128 with VPU adds; every element of the
        # (8, 128) output block is a genuine partial sum.
        out_ref[...] = acc_ref[...].reshape(8, w // _LANE, _LANE).sum(axis=1)


def _scale_kernel(scale_ref, x_ref, o_ref):
    o_ref[...] = (x_ref[...].astype(jnp.float32) * scale_ref[0, 0]).astype(
        o_ref.dtype)


# ------------------------------------------------------------ pallas calls --
def _pallas_fused(x2d, output_mean, out_dtype, n, vmem_limit):
    rows, w = x2d.shape
    om = jnp.full((1, 1), output_mean, jnp.float32)
    kernel = functools.partial(_fused_kernel, inv_n=float(1.0 / n))
    return pl.pallas_call(
        kernel,
        out_shape=jax.ShapeDtypeStruct((rows, w), out_dtype),
        grid_spec=pltpu.PrefetchScalarGridSpec(
            num_scalar_prefetch=0,
            grid=(1,),
            in_specs=[
                pl.BlockSpec(memory_space=pltpu.MemorySpace.SMEM),
                pl.BlockSpec((rows, w), lambda i: (0, 0)),
            ],
            out_specs=pl.BlockSpec((rows, w), lambda i: (0, 0)),
        ),
        compiler_params=pltpu.CompilerParams(
            dimension_semantics=("arbitrary",),
            vmem_limit_bytes=vmem_limit,
        ),
    )(om, x2d)


def _pallas_sum(x2d, vmem_limit, block_bytes):
    rows, w = x2d.shape
    itemsize = jnp.dtype(x2d.dtype).itemsize

    tr = max(8, (block_bytes // (w * itemsize)) // 8 * 8)
    if rows <= tr:
        tr = rows if rows % 8 == 0 else max(8, (rows // 8) * 8)
    nb = pl.cdiv(rows, tr)
    num_shards = 2 if nb >= 2 else 1        # second TensorCore on v7x
    inner = pl.cdiv(nb, num_shards)
    may_mask = (rows % tr != 0) or (inner * num_shards != nb)

    kernel = functools.partial(_sum_kernel, valid_rows=rows, block_rows=tr,
                               inner=inner, may_mask=may_mask)

    partials = pl.pallas_call(
        kernel,
        out_shape=jax.ShapeDtypeStruct((8 * num_shards, _LANE), jnp.float32),
        grid_spec=pltpu.PrefetchScalarGridSpec(
            num_scalar_prefetch=0,
            grid=(num_shards, inner),
            in_specs=[pl.BlockSpec(
                (tr, w),
                # clamp keeps the DMA in bounds; duplicate blocks are masked
                lambda c, i: (jnp.minimum(c * inner + i, nb - 1), 0))],
            out_specs=pl.BlockSpec((8, _LANE), lambda c, i: (c, 0)),
            scratch_shapes=[pltpu.VMEM((8, w), jnp.float32)],
        ),
        compiler_params=pltpu.CompilerParams(
            dimension_semantics=("parallel", "arbitrary"),
            vmem_limit_bytes=vmem_limit,
        ),
    )(x2d)
    return jnp.sum(partials)   # tiny XLA reduce of (8*shards, 128) partials


def _pallas_scale(x2d, scale, out_dtype, vmem_limit, block_bytes):
    rows, w = x2d.shape
    itemsize = jnp.dtype(x2d.dtype).itemsize
    tr = max(8, (block_bytes // (w * itemsize)) // 8 * 8)
    if rows <= tr:
        tr = rows
    return pl.pallas_call(
        _scale_kernel,
        out_shape=jax.ShapeDtypeStruct((rows, w), out_dtype),
        grid_spec=pltpu.PrefetchScalarGridSpec(
            num_scalar_prefetch=0,
            grid=(pl.cdiv(rows, tr),),
            in_specs=[
                pl.BlockSpec(memory_space=pltpu.MemorySpace.SMEM),
                pl.BlockSpec((tr, w), lambda i: (i, 0)),
            ],
            out_specs=pl.BlockSpec((tr, w), lambda i: (i, 0)),
        ),
        compiler_params=pltpu.CompilerParams(
            dimension_semantics=("parallel",),
            vmem_limit_bytes=vmem_limit,
        ),
    )(scale, x2d)


# ------------------------------------------------------------------ wrapper --
def normalize_intensity(x, output_mean):
    """Pallas equivalent of NormalizeIntensity(output_mean).forward(x)."""
    orig_shape = x.shape
    orig_dtype = x.dtype
    n = int(x.size)
    if n == 0:
        return x

    x_flat = x.reshape(-1)

    # Split off a (<128-element) tail so the main slab reshapes with no pad.
    n_main = (n // _LANE) * _LANE
    if n_main == 0:
        # TODO(synk): sub-128-element inputs handled with plain XLA ops
        # (too small to be worth a kernel launch).
        mean = jnp.mean(x_flat.astype(jnp.float32))
        scale = jnp.float32(output_mean) / (mean + jnp.float32(1e-6))
        return (x_flat.astype(jnp.float32) * scale).astype(orig_dtype).reshape(
            orig_shape)

    main = x_flat if n_main == n else x_flat[:n_main]
    tail = x_flat[n_main:]                      # usually empty
    w = _pick_width(n_main)
    rows = n_main // w
    x2d = main.reshape(rows, w)

    vmem_limit = _vmem_limit_bytes()
    p1_bytes, p2_bytes = _block_bytes(vmem_limit)

    # ---- fast path: single fused pass, whole tensor resident in VMEM ----
    if n_main == n and n * 4 <= _FAST_PATH_F32_BYTES:
        out2d = _pallas_fused(x2d, output_mean, orig_dtype, n, vmem_limit)
        return out2d.reshape(orig_shape)

    # ---- pass 1: global sum ----
    total = _pallas_sum(x2d, vmem_limit, p1_bytes)
    if n_main != n:
        total = total + jnp.sum(tail.astype(jnp.float32))

    # Tiny scalar math (negligible next to the HBM passes).
    mean = total / jnp.float32(n)
    scale = jnp.float32(output_mean) / (mean + jnp.float32(1e-6))

    # ---- pass 2: elementwise scale (scale delivered via SMEM scalar) ----
    out2d = _pallas_scale(x2d, scale.reshape(1, 1), orig_dtype,
                          vmem_limit, p2_bytes)
    out_flat = out2d.reshape(n_main)
    if n_main != n:
        tail_out = (tail.astype(jnp.float32) * scale).astype(orig_dtype)
        out_flat = jnp.concatenate([out_flat, tail_out])
    return out_flat.reshape(orig_shape)


class NormalizeIntensity:
    """Thin module-like wrapper mirroring the PyTorch class."""

    def __init__(self, output_mean):
        self.output_mean = output_mean

    def __call__(self, x):
        return normalize_intensity(x, self.output_mean)

    # TODO(synk): inverse() raises NotImplementedError in PyTorch; intentionally not implemented.


if __name__ == "__main__":
    key = jax.random.PRNGKey(0)
    x = jax.random.normal(key, (2, 4, 16, 16), dtype=jnp.float32)

    output_mean = 0.5
    mod = NormalizeIntensity(output_mean)

    y = jax.block_until_ready(mod(x))

    # Reference: x / (x.mean() + 1e-6) * output_mean
    ref = x / (jnp.mean(x) + 1e-6) * output_mean

    assert y.shape == x.shape and y.dtype == x.dtype
    assert bool(jnp.allclose(y, ref, rtol=1e-4, atol=1e-5)), "mismatch vs reference"

    print("KERNEL_OK")
</pallas_src>

<mosaic_0001>
module attributes {stable_mosaic.version = 11 : i64} {
  func.func @_fused_kernel(%arg0: i32, %arg1: memref<1x1xf32, #tpu.memory_space<smem>>, %arg2: memref<1x2048xf32, #tpu.memory_space<vmem>>, %arg3: memref<1x2048xf32, #tpu.memory_space<vmem>>) attributes {dimension_semantics = [#tpu.dimension_semantics<arbitrary>], iteration_bounds = array<i64: 1>, scalar_prefetch = 0 : i64, scratch_operands = 0 : i64, tpu.core_type = #tpu.core_type<tc>, window_params = [{transform_indices = @transform_0, window_bounds = array<i64: 1, 1>}, {pipeline_mode = #tpu.pipeline_mode<synchronous>, transform_indices = @transform_1, window_bounds = array<i64: 1, 2048>}, {pipeline_mode = #tpu.pipeline_mode<synchronous>, transform_indices = @transform_2, window_bounds = array<i64: 1, 2048>}]} {
    %c0 = arith.constant 0 : index
    %c0_0 = arith.constant 0 : index
    %0 = vector.load %arg2[%c0, %c0_0] : memref<1x2048xf32, #tpu.memory_space<vmem>>, vector<1x2048xf32>
    %1 = vector.shape_cast %0 : vector<1x2048xf32> to vector<1x1x2048xf32>
    %cst = arith.constant dense<0.000000e+00> : vector<1xf32>
    %2 = vector.multi_reduction <add>, %1, %cst [1, 2] : vector<1x1x2048xf32> to vector<1xf32>
    %3 = vector.shape_cast %2 : vector<1xf32> to vector<1x1x1xf32>
    %4 = vector.extract %3[0, 0, 0] : f32 from vector<1x1x1xf32>
    %cst_1 = arith.constant 4.8828125E-4 : f32
    %5 = arith.mulf %4, %cst_1 : f32
    %c0_2 = arith.constant 0 : index
    %c0_3 = arith.constant 0 : index
    %6 = memref.load %arg1[%c0_2, %c0_3] : memref<1x1xf32, #tpu.memory_space<smem>>
    %cst_4 = arith.constant 9.99999997E-7 : f32
    %7 = arith.addf %5, %cst_4 : f32
    %8 = arith.divf %6, %7 : f32
    %9 = vector.broadcast %8 : f32 to vector<1x2048xf32>
    %10 = arith.mulf %0, %9 : vector<1x2048xf32>
    %c0_5 = arith.constant 0 : index
    %c0_6 = arith.constant 0 : index
    %11 = vector.load %arg3[%c0_5, %c0_6] : memref<1x2048xf32, #tpu.memory_space<vmem>>, vector<1x2048xf32>
    tpu.vector_store %arg3[%c0_5, %c0_6], %10 {strides = array<i32>} : memref<1x2048xf32, #tpu.memory_space<vmem>>, vector<1x2048xf32>,
    return
  }
  func.func @transform_0(%arg0: i32) -> (i32, i32) {
    %c0_i32 = arith.constant 0 : i32
    %c0_i32_0 = arith.constant 0 : i32
    %c0_i32_1 = arith.constant 0 : i32
    return %c0_i32, %c0_i32_0 : i32, i32
  }
  func.func @transform_1(%arg0: i32) -> (i32, i32) {
    %c0_i32 = arith.constant 0 : i32
    %c0_i32_0 = arith.constant 0 : i32
    %c0_i32_1 = arith.constant 0 : i32
    return %c0_i32, %c0_i32_0 : i32, i32
  }
  func.func @transform_2(%arg0: i32) -> (i32, i32) {
    %c0_i32 = arith.constant 0 : i32
    %c0_i32_0 = arith.constant 0 : i32
    %c0_i32_1 = arith.constant 0 : i32
    return %c0_i32, %c0_i32_0 : i32, i32
  }
}

</mosaic_0001>

<bundles_post_ra>
// kernel: tpu_custom_call.1
= control target key start
LH: loop header
LB: loop body
LE: loop exit
PB: predicated region body
PF: predicated region fallthrough
CT: control target
= control target key end

     0   :  { %8 = vsyncpa [#allocation4], 0  ;;  %s304_s0 = inlined_call_operand.<no memory space> [shape: f32[1,1], index: 0, kind: input, shape index: {}]   ;;  %s305_s1 = inlined_call_operand.hbm [shape: f32[1,2048], index: 1, kind: input, shape index: {}]   ;;  %s306_s2 = inlined_call_operand.hbm [shape: f32[1,2048], index: 2, kind: output, shape index: {}]  }
   0x1   :  { %9 = vsyncpa [#allocation5], 0  ;;  %s233_s9 = smov [#allocation3]   ;;  %s185_s13 = scalar_lea.hbm %s305_s1, 256 }
   0x2   :  { %s18_s10 = sshll.u32 %s233_s9, 4  ;;  %p186_p0 = scmp.ne.s32.totalorder %s305_s1, %s185_s13  ;;  %s19_s10 = int_to_ptr.vmem [resolvable:$true] %s18_s10 }
   0x3   :  { %p189_p1 = scmp.lt.u32.totalorder %s185_s13, %s305_s1 }
   0x5   :  { %p191_p2 = pnand %p189_p1, %p186_p0 }
   0x7   :  { %194 = shalt.err (!%p191_p2)
}
   0x8   :  { %s195_s18 = scalar_lea.vmem %s19_s10, 256  ;;  %p200_p4 = scmp.lt.s32.totalorder %s19_s10, %s19_s10 }
   0x9   :  { %p196_p3 = scmp.ne.s32.totalorder %s19_s10, %s195_s18  ;;  %p201_p5 = scmp.lt.s32.totalorder %s195_s18, %s195_s18 }
   0xb   :  { %p202_p6 = por %p201_p5, %p200_p4 }
   0xd   :  { %p203_p7 = pnand %p202_p6, %p196_p3 }
   0xf   :  { %206 = shalt.err (!%p203_p7)
}
  0x10   :  { %21 = dma.hbm_to_vmem [thread:$0]  %s305_s1, 256, %s19_s10, [#allocation4]  }
  0x11   :  { %229 = dma.done.wait [#allocation4], 256  }
  0x12   :  { %230 = vsyncadd [#allocation4], 4294967040  ;;  %v29_v0 = vlaneseq  ;;  %v262_v6 = vld [vmem:[#allocation3] sm:$0xff]  ;;  %vm109_vm0 = vcmask 1040384   ;;  %v26_v25 = vld [vmem:[#allocation3 + $0x8] sm:$0xff]  ;;  %s234_s27 = smov [#allocation6]  }
  0x13   :  { %s168_s28 = sshll.u32 %s234_s27, 4  ;;  %s169_s28 = int_to_ptr.vmem [resolvable:$true] %s168_s28 }
  0x14   :  { %v30_v1 = vshrl.u32 %v29_v0, 7  ;;  %s207_s29 = scalar_lea.vmem %s169_s28, 256  ;;  %p212_p9 = scmp.lt.s32.totalorder %s169_s28, %s169_s28 }
  0x15   :  { %p208_p8 = scmp.ne.s32.totalorder %s169_s28, %s207_s29  ;;  %p213_p10 = scmp.lt.s32.totalorder %s207_s29, %s207_s29 }
  0x16   :  { %v31_v2 = vsub.s32 0, %v30_v1  ;;  %v35_v3 = vsub.s32 1, %v30_v1  ;;  %v39_v4 = vsub.s32 2, %v30_v1  ;;  %v43_v5 = vsub.s32 3, %v30_v1 }
  0x17   :  { %v47_v10 = vsub.s32 4, %v30_v1  ;;  %v51_v12 = vsub.s32 5, %v30_v1  ;;  %v55_v13 = vsub.s32 6, %v30_v1  ;;  %v59_v20 = vsub.s32 7, %v30_v1  ;;  %p214_p11 = por %p213_p10, %p212_p9 }
  0x18   :  { %v32_v7 = vrot.slane %v262_v6, %v31_v2  ;;  %v36_v8 = vrot.slane %v262_v6, %v35_v3  ;;  %v40_v9 = vrot.slane %v262_v6, %v39_v4  ;;  %v44_v11 = vrot.slane %v262_v6, %v43_v5 }
  0x19   :  { %v48_v14 = vrot.slane %v262_v6, %v47_v10  ;;  %v52_v19 = vrot.slane %v262_v6, %v51_v12  ;;  %v56_v23 = vrot.slane %v262_v6, %v55_v13  ;;  %v60_v27 = vrot.slane %v262_v6, %v59_v20  ;;  %p215_p12 = pnand %p214_p11, %p208_p8 }
  0x1a   :  { %v110_v15 = vsel %vm109_vm0, %v32_v7, 0.0  ;;  %v111_v16 = vsel %vm109_vm0, %v36_v8, 0.0  ;;  %v113_v17 = vsel %vm109_vm0, %v40_v9, 0.0  ;;  %v115_v21 = vsel %vm109_vm0, %v44_v11, 0.0 }
  0x1b   :  { %v112_v18 = vadd.f32 %v111_v16, %v110_v15  ;;  %v117_v24 = vsel %vm109_vm0, %v48_v14, 0.0  ;;  %v119_v28 = vsel %vm109_vm0, %v52_v19, 0.0  ;;  %v64_v30 = vrot.slane %v26_v25, %v31_v2 }
  0x1c   :  { %v121_v31 = vsel %vm109_vm0, %v56_v23, 0.0  ;;  %v68_v33 = vrot.slane %v26_v25, %v35_v3  ;;  %v123_v34 = vsel %vm109_vm0, %v60_v27, 0.0  ;;  %v72_v36 = vrot.slane %v26_v25, %v39_v4 }
  0x1d   :  { %v114_v22 = vadd.f32 %v113_v17, %v112_v18  ;;  %v125_v37 = vsel %vm109_vm0, %v64_v30, 0.0  ;;  %v76_v39 = vrot.slane %v26_v25, %v43_v5  ;;  %v80_v42 = vrot.slane %v26_v25, %v47_v10 }
  0x1e   :  { %v127_v40 = vsel %vm109_vm0, %v68_v33, 0.0  ;;  %v129_v43 = vsel %vm109_vm0, %v72_v36, 0.0  ;;  %v84_v45 = vrot.slane %v26_v25, %v51_v12  ;;  %v88_v48 = vrot.slane %v26_v25, %v55_v13 }
  0x1f   :  { %v116_v26 = vadd.f32 %v115_v21, %v114_v22  ;;  %v131_v46 = vsel %vm109_vm0, %v76_v39, 0.0  ;;  %v133_v49 = vsel %vm109_vm0, %v80_v42, 0.0  ;;  %v92_v51 = vrot.slane %v26_v25, %v59_v20 }
  0x20   :  { %v135_v52 = vsel %vm109_vm0, %v84_v45, 0.0  ;;  %v137_v54 = vsel %vm109_vm0, %v88_v48, 0.0 }
  0x21   :  { %v118_v29 = vadd.f32 %v117_v24, %v116_v26  ;;  %v139_v56 = vsel %vm109_vm0, %v92_v51, 0.0 }
  0x23   :  { %v120_v32 = vadd.f32 %v119_v28, %v118_v29 }
  0x25   :  { %v122_v35 = vadd.f32 %v121_v31, %v120_v32 }
  0x27   :  { %v124_v38 = vadd.f32 %v123_v34, %v122_v35 }
  0x29   :  { %v126_v41 = vadd.f32 %v125_v37, %v124_v38 }
  0x2b   :  { %v128_v44 = vadd.f32 %v127_v40, %v126_v41 }
  0x2d   :  { %v130_v47 = vadd.f32 %v129_v43, %v128_v44 }
  0x2f   :  { %v132_v50 = vadd.f32 %v131_v46, %v130_v47 }
  0x31   :  { %v134_v53 = vadd.f32 %v133_v49, %v132_v50 }
  0x33   :  { %v136_v55 = vadd.f32 %v135_v52, %v134_v53 }
  0x35   :  { %v138_v57 = vadd.f32 %v137_v54, %v136_v55 }
  0x37   :  { %v140_v58 = vadd.f32 %v139_v56, %v138_v57 }
  0x39   :  { %141 = vadd.xlane.f32.xlu0 %v140_v58 }
  0xc6   :  { %v142_v59 = vpop.xlane.xlu0 %141 }
  0xc7   :  { %v143_v60 = vrot.slane %v142_v59, 4 }
  0xc9   :  { %v144_v61 = vadd.f32 %v143_v60, %v142_v59 }
  0xcb   :  { %v145_v62 = vrot.slane %v144_v61, 2 }
  0xcd   :  { %v146_v63 = vadd.f32 %v145_v62, %v144_v61 }
  0xcf   :  { %v147_v0 = vrot.slane %v146_v63, 1 }
  0xd1   :  { %v148_v1 = vadd.f32 %v147_v0, %v146_v63 }
  0xd3   :  { %177 = vpush %v148_v1 }
 0x104   :  { %s178_s1 = spop %177 }
 0x105   :  { %s150_s21 = smul.f32 0.00048828125, %s178_s1 }
 0x107   :  { %s152_s22 = sadd.f32 1e-06, %s150_s21 }
 0x109   :  { %v153_v2 = vstv %s152_s22 }
 0x10a   :  { %183 = vrcp.f32 %v153_v2 }
 0x114   :  { %v184_v3 = vpop.eup %183 }
 0x115   :  { %179 = vpush %v184_v3 }
 0x146   :  { %s180_s23 = spop %179 }
 0x147   :  { %s156_s26 = smul.f32 %s180_s23, %s304_s0 }
 0x149   :  { %v157_v4 = vstv %s156_s26 }
 0x14a   :  { %v158_v5 = vmul.f32 %v157_v4, %v262_v6  ;;  %v159_v7 = vmul.f32 %v157_v4, %v26_v25 }
 0x14c   :  { %160 = vst [vmem:[#allocation6] sm:$0xff] %v158_v5  ;;  %161 = vst [vmem:[#allocation6 + $0x8] sm:$0xff] %v159_v7 }
 0x14d   :  { %218 = shalt.err (!%p215_p12)
}
 0x14e   :  { %s219_s0 = scalar_lea.hbm %s306_s2, 256 }
 0x14f   :  { %p220_p13 = scmp.ne.s32.totalorder %s306_s2, %s219_s0  ;;  %p223_p0 = scmp.lt.u32.totalorder %s219_s0, %s306_s2 }
 0x151   :  { %p225_p1 = pnand %p223_p0, %p220_p13 }
 0x153   :  { %228 = shalt.err (!%p225_p1)
}
 0x154   :  { %171 = dma.vmem_to_hbm [thread:$0]  %s169_s28, 256, %s306_s2, [#allocation5]  }
 0x155   :  { %231 = dma.done.wait [#allocation5], 256  }
 0x156   :  { %232 = vsyncadd [#allocation5], 4294967040 }
 0x157   :  { %175 = vsyncpa [#allocation4], 1 }
 0x158   :  { %176 = vsyncpa [#allocation5], 1 }

</bundles_post_ra>
